<compile_context>
chip_gen: v7x
topology: tpu7x:2x2x1
jax: 0.10.0
libtpu: 0.0.40
codegen_flags: <defaults>
</compile_context>

<pallas_src>
import jax
import jax.numpy as jnp
from jax import lax
from jax.experimental import pallas as pl
from jax.experimental.pallas import tpu as pltpu


def _focal_terms(x, y, gamma, alpha):
    """Elementwise focal-loss terms (matches torch BCE-with-logits + modulator)."""
    x = x.astype(jnp.float32)
    y = y.astype(jnp.float32)
    # Numerically-stable BCE with logits, reduction='none':
    #   bce = max(x, 0) - x*y + log(1 + exp(-|x|))
    bce = jnp.maximum(x, 0.0) - x * y + jnp.log1p(jnp.exp(-jnp.abs(x)))
    w = 1.0 - jnp.exp(-bce)           # = 1 - pt, in [0, 1)
    if gamma == 2.0:
        mod = w * w                   # avoid float pow (saves EUP work)
    elif gamma == 1.0:
        mod = w
    elif gamma == 0.0:
        mod = None
    elif gamma == 0.5:
        mod = jnp.sqrt(w)
    else:
        # Generic gamma via guarded exp/log (avoids pow lowering; w==0 -> 0).
        safe = jnp.where(w > 0.0, w, 1.0)
        mod = jnp.where(w > 0.0, jnp.exp(gamma * jnp.log(safe)), 0.0)
    focal = bce if mod is None else mod * bce
    if alpha is not None:
        focal = alpha * focal
    return focal


def _make_focal_kernel(gamma, alpha, chunk_rows, lanes, n_chunks, unroll):
    def kernel(x_ref, y_ref, o_ref):
        if n_chunks == 1:
            acc = _focal_terms(x_ref[...], y_ref[...], gamma, alpha)
        else:
            def body(c, acc):
                r0 = pl.multiple_of(c * chunk_rows, chunk_rows)
                xv = x_ref[pl.ds(r0, chunk_rows), :]
                yv = y_ref[pl.ds(r0, chunk_rows), :]
                return acc + _focal_terms(xv, yv, gamma, alpha)

            acc = lax.fori_loop(0, n_chunks, body,
                                jnp.zeros((chunk_rows, lanes), jnp.float32),
                                unroll=unroll)

        # Output block index depends only on the outer (parallel) grid axis, so
        # it stays VMEM-resident across the inner (arbitrary) reduction axis.
        @pl.when(pl.program_id(1) == 0)
        def _():
            o_ref[...] = jnp.zeros_like(o_ref)

        o_ref[...] += acc

    return kernel


def focal_loss(x, y, gamma: float = 2.0, alpha=None):
    """Mean binary focal loss over all elements of x (logits) vs y (targets)."""
    assert x.shape == y.shape, "x and y must have identical shapes"
    n = int(x.size)
    assert n > 0
    gamma = float(gamma)
    alpha = None if alpha is None else float(alpha)

    xf = jnp.ravel(x)
    yf = jnp.ravel(y)

    # Lane width: largest of {512, 256, 128} dividing n -> the reshape below is
    # a free bitcast (no HBM copy).  If n is not 128-divisible (rare), the
    # kernel covers the largest 512-aligned prefix and the tail goes to JAX.
    lanes = next((c for c in (512, 256, 128) if n % c == 0), None)
    if lanes is None:
        lanes = 512 if n >= 512 else n
    n_main = (n // lanes) * lanes
    rows_all = n_main // lanes

    x2 = (xf if n_main == n else xf[:n_main]).reshape(rows_all, lanes)
    y2 = (yf if n_main == n else yf[:n_main]).reshape(rows_all, lanes)

    # ~2 MiB (f32) of rows per input block: near the HBM roofline while staying
    # well inside the default scoped-VMEM limit on v5e/v6e/v7x
    # (2 inputs x 2 pipeline buffers x 2 MiB = 8 MiB, plus a tiny output tile).
    max_block_rows = max(8, (2 << 20) // (lanes * 4))

    if rows_all >= 16:
        # At least 2 blocks so the "parallel" outer axis feeds both v7x
        # TensorCores with real (never padded) data; harmless on v5e/v6e.
        n_blocks = max(2, pl.cdiv(rows_all, max_block_rows))
        n_blocks += n_blocks % 2                      # even -> balanced halves
        block_rows = ((rows_all // n_blocks) // 8) * 8
        n_outer, n_inner = 2, n_blocks // 2
        chunk_rows = 8
    elif rows_all >= 8:
        block_rows = (rows_all // 8) * 8
        n_outer, n_inner, chunk_rows = 1, 1, 8
    else:
        # Tiny input: single block equal to the full array (no 8-row constraint).
        block_rows = rows_all
        n_outer, n_inner, chunk_rows = 1, 1, rows_all

    kernel_rows = n_outer * n_inner * block_rows
    n_chunks = block_rows // chunk_rows
    unroll = min(2, n_chunks)

    kernel = _make_focal_kernel(gamma, alpha, chunk_rows, lanes, n_chunks, unroll)

    partials = pl.pallas_call(
        kernel,
        out_shape=jax.ShapeDtypeStruct((n_outer * chunk_rows, lanes), jnp.float32),
        grid_spec=pl.GridSpec(
            grid=(n_outer, n_inner),
            in_specs=[
                pl.BlockSpec((block_rows, lanes), lambda o, i: (o * n_inner + i, 0)),
                pl.BlockSpec((block_rows, lanes), lambda o, i: (o * n_inner + i, 0)),
            ],
            out_specs=pl.BlockSpec((chunk_rows, lanes), lambda o, i: (o, 0)),
        ),
        compiler_params=pltpu.CompilerParams(
            dimension_semantics=("parallel", "arbitrary"),
        ),
    )(x2, y2)

    total = jnp.sum(partials)

    k = kernel_rows * lanes
    if k < n:
        # Leftover rows + lane tail (< 2 blocks of elements): plain JAX, exact.
        total = total + jnp.sum(_focal_terms(xf[k:], yf[k:], gamma, alpha))

    return total / jnp.float32(n)


def _focal_loss_ref(x, y, gamma=2.0, alpha=None):
    x = x.astype(jnp.float32)
    y = y.astype(jnp.float32)
    bce = jnp.maximum(x, 0.0) - x * y + jnp.log1p(jnp.exp(-jnp.abs(x)))
    pt = jnp.exp(-bce)
    focal = (1.0 - pt) ** gamma * bce
    if alpha is not None:
        focal = alpha * focal
    return jnp.mean(focal)


if __name__ == "__main__":
    key = jax.random.PRNGKey(0)
    kx, ky, kx2, ky2 = jax.random.split(key, 4)

    # Small segmentation-style logits map: NCHW.
    B, C, H, W = 2, 4, 16, 16
    x = jax.random.normal(kx, (B, C, H, W), dtype=jnp.float32) * 2.0   # logits
    y = jax.random.uniform(ky, (B, C, H, W), dtype=jnp.float32)        # targets in [0,1]

    loss = jax.block_until_ready(focal_loss(x, y, gamma=2.0, alpha=None))
    ref = _focal_loss_ref(x, y, gamma=2.0, alpha=None)
    assert jnp.allclose(loss, ref, rtol=2e-5, atol=1e-6), (loss, ref)

    # alpha path (uniform scale, as in the reference module).
    loss_a = jax.block_until_ready(focal_loss(x, y, gamma=2.0, alpha=0.25))
    ref_a = _focal_loss_ref(x, y, gamma=2.0, alpha=0.25)
    assert jnp.allclose(loss_a, ref_a, rtol=2e-5, atol=1e-6), (loss_a, ref_a)

    # Non-128-divisible size + generic gamma: exercises the JAX tail path and
    # the guarded exp(gamma*log(w)) modulator inside the kernel.
    xo = jax.random.normal(kx2, (3, 341), dtype=jnp.float32) * 2.0
    yo = jax.random.uniform(ky2, (3, 341), dtype=jnp.float32)
    loss_o = jax.block_until_ready(focal_loss(xo, yo, gamma=1.5, alpha=0.5))
    ref_o = _focal_loss_ref(xo, yo, gamma=1.5, alpha=0.5)
    assert jnp.allclose(loss_o, ref_o, rtol=1e-4, atol=1e-6), (loss_o, ref_o)

    print("KERNEL_OK")
</pallas_src>

<mosaic_0001>
module attributes {stable_mosaic.version = 11 : i64} {
  func.func @kernel(%arg0: i32, %arg1: i32, %arg2: memref<4x512xf32, #tpu.memory_space<vmem>>, %arg3: memref<4x512xf32, #tpu.memory_space<vmem>>, %arg4: memref<4x512xf32, #tpu.memory_space<vmem>>) attributes {dimension_semantics = [#tpu.dimension_semantics<parallel>, #tpu.dimension_semantics<arbitrary>], iteration_bounds = array<i64: 1, 1>, scalar_prefetch = 0 : i64, scratch_operands = 0 : i64, tpu.core_type = #tpu.core_type<tc>, window_params = [{transform_indices = @transform_0, window_bounds = array<i64: 4, 512>}, {transform_indices = @transform_1, window_bounds = array<i64: 4, 512>}, {transform_indices = @transform_2, window_bounds = array<i64: 4, 512>}]} {
    %c0 = arith.constant 0 : index
    %c0_0 = arith.constant 0 : index
    %0 = vector.load %arg2[%c0, %c0_0] : memref<4x512xf32, #tpu.memory_space<vmem>>, vector<4x512xf32>
    %c0_1 = arith.constant 0 : index
    %c0_2 = arith.constant 0 : index
    %1 = vector.load %arg3[%c0_1, %c0_2] : memref<4x512xf32, #tpu.memory_space<vmem>>, vector<4x512xf32>
    %cst = arith.constant 0.000000e+00 : f32
    %2 = vector.broadcast %cst : f32 to vector<4x512xf32>
    %3 = arith.maximumf %0, %2 : vector<4x512xf32>
    %4 = arith.mulf %0, %1 : vector<4x512xf32>
    %5 = arith.subf %3, %4 : vector<4x512xf32>
    %6 = math.absf %0 : vector<4x512xf32>
    %cst_3 = arith.constant 0.000000e+00 : f32
    %7 = vector.broadcast %cst_3 : f32 to vector<4x512xf32>
    %8 = arith.subf %7, %6 : vector<4x512xf32>
    %9 = math.exp %8 : vector<4x512xf32>
    %10 = math.log1p %9 : vector<4x512xf32>
    %11 = arith.addf %5, %10 : vector<4x512xf32>
    %cst_4 = arith.constant 0.000000e+00 : f32
    %12 = vector.broadcast %cst_4 : f32 to vector<4x512xf32>
    %13 = arith.subf %12, %11 : vector<4x512xf32>
    %14 = math.exp %13 : vector<4x512xf32>
    %cst_5 = arith.constant 1.000000e+00 : f32
    %15 = vector.broadcast %cst_5 : f32 to vector<4x512xf32>
    %16 = arith.subf %15, %14 : vector<4x512xf32>
    %17 = arith.mulf %16, %16 : vector<4x512xf32>
    %18 = arith.mulf %17, %11 : vector<4x512xf32>
    %c0_i32 = arith.constant 0 : i32
    %19 = arith.cmpi eq, %arg1, %c0_i32 : i32
    %20 = arith.extui %19 : i1 to i32
    %c0_i32_6 = arith.constant 0 : i32
    %21 = arith.cmpi ne, %20, %c0_i32_6 : i32
    scf.if %21 {
      %cst_11 = arith.constant 0.000000e+00 : f32
      %25 = vector.broadcast %cst_11 : f32 to vector<4x512xf32>
      %c0_12 = arith.constant 0 : index
      %c0_13 = arith.constant 0 : index
      %26 = vector.load %arg4[%c0_12, %c0_13] : memref<4x512xf32, #tpu.memory_space<vmem>>, vector<4x512xf32>
      tpu.vector_store %arg4[%c0_12, %c0_13], %25 {strides = array<i32>} : memref<4x512xf32, #tpu.memory_space<vmem>>, vector<4x512xf32>,
    } else {
    }
    %c0_7 = arith.constant 0 : index
    %c0_8 = arith.constant 0 : index
    %22 = vector.load %arg4[%c0_7, %c0_8] : memref<4x512xf32, #tpu.memory_space<vmem>>, vector<4x512xf32>
    %23 = arith.addf %22, %18 : vector<4x512xf32>
    %c0_9 = arith.constant 0 : index
    %c0_10 = arith.constant 0 : index
    %24 = vector.load %arg4[%c0_9, %c0_10] : memref<4x512xf32, #tpu.memory_space<vmem>>, vector<4x512xf32>
    tpu.vector_store %arg4[%c0_9, %c0_10], %23 {strides = array<i32>} : memref<4x512xf32, #tpu.memory_space<vmem>>, vector<4x512xf32>,
    return
  }
  func.func @transform_0(%arg0: i32, %arg1: i32) -> (i32, i32) {
    %c1_i32 = arith.constant 1 : i32
    %0 = arith.muli %arg0, %c1_i32 : i32
    %1 = arith.addi %0, %arg1 : i32
    %c0_i32 = arith.constant 0 : i32
    %c0_i32_0 = arith.constant 0 : i32
    return %1, %c0_i32 : i32, i32
  }
  func.func @transform_1(%arg0: i32, %arg1: i32) -> (i32, i32) {
    %c1_i32 = arith.constant 1 : i32
    %0 = arith.muli %arg0, %c1_i32 : i32
    %1 = arith.addi %0, %arg1 : i32
    %c0_i32 = arith.constant 0 : i32
    %c0_i32_0 = arith.constant 0 : i32
    return %1, %c0_i32 : i32, i32
  }
  func.func @transform_2(%arg0: i32, %arg1: i32) -> (i32, i32) {
    %c0_i32 = arith.constant 0 : i32
    %c0_i32_0 = arith.constant 0 : i32
    return %arg0, %c0_i32 : i32, i32
  }
}

</mosaic_0001>

<bundles_post_ra>
// kernel: tpu_custom_call.1
= control target key start
LH: loop header
LB: loop body
LE: loop exit
PB: predicated region body
PF: predicated region fallthrough
CT: control target
= control target key end

     0   :  { %7 = vsyncpa [#allocation3], 0  ;;  %s266_s0 = inlined_call_operand.hbm [shape: f32[4,512], index: 0, kind: input, shape index: {}]   ;;  %s267_s1 = inlined_call_operand.hbm [shape: f32[4,512], index: 1, kind: input, shape index: {}]   ;;  %s268_s2 = inlined_call_operand.hbm [shape: f32[4,512], index: 2, kind: output, shape index: {}]  }
   0x1   :  { %8 = vsyncpa [#allocation6], 0 }
   0x2   :  { %9 = vsyncpa [#allocation4], 0  ;;  %s212_s9 = smov [#allocation2]   ;;  %s213_s11 = smov [#allocation5]  }
   0x3   :  { %s20_s10 = sshll.u32 %s212_s9, 4  ;;  %s34_s12 = sshll.u32 %s213_s11, 4  ;;  %s21_s10 = int_to_ptr.vmem [resolvable:$true] %s20_s10  ;;  %s35_s12 = int_to_ptr.vmem [resolvable:$true] %s34_s12 }
   0x4   :  { %s140_s15 = scalar_lea.hbm %s266_s0, 256 }
   0x5   :  { %p141_p0 = scmp.ne.s32.totalorder %s266_s0, %s140_s15  ;;  %p144_p1 = scmp.lt.u32.totalorder %s140_s15, %s266_s0 }
   0x7   :  { %p146_p2 = pnand %p144_p1, %p141_p0 }
   0x9   :  { %149 = shalt.err (!%p146_p2)
}
   0xa   :  { %s150_s20 = scalar_lea.vmem %s21_s10, 256  ;;  %p155_p4 = scmp.lt.s32.totalorder %s21_s10, %s21_s10 }
   0xb   :  { %p151_p3 = scmp.ne.s32.totalorder %s21_s10, %s150_s20  ;;  %p156_p5 = scmp.lt.s32.totalorder %s150_s20, %s150_s20 }
   0xd   :  { %p157_p6 = por %p156_p5, %p155_p4 }
   0xf   :  { %p158_p7 = pnand %p157_p6, %p151_p3 }
  0x11   :  { %161 = shalt.err (!%p158_p7)
}
  0x12   :  { %23 = dma.hbm_to_vmem [thread:$0]  %s266_s0, 256, %s21_s10, [#allocation3]  }
  0x13   :  { %s162_s25 = scalar_lea.hbm %s267_s1, 256 }
  0x14   :  { %p163_p8 = scmp.ne.s32.totalorder %s267_s1, %s162_s25  ;;  %p166_p9 = scmp.lt.u32.totalorder %s162_s25, %s267_s1 }
  0x16   :  { %p168_p10 = pnand %p166_p9, %p163_p8 }
  0x18   :  { %171 = shalt.err (!%p168_p10)
}
  0x19   :  { %s172_s30 = scalar_lea.vmem %s35_s12, 256  ;;  %p177_p12 = scmp.lt.s32.totalorder %s35_s12, %s35_s12 }
  0x1a   :  { %p173_p11 = scmp.ne.s32.totalorder %s35_s12, %s172_s30  ;;  %p178_p13 = scmp.lt.s32.totalorder %s172_s30, %s172_s30 }
  0x1c   :  { %p179_p0 = por %p178_p13, %p177_p12 }
  0x1e   :  { %p180_p1 = pnand %p179_p0, %p173_p11 }
  0x20   :  { %183 = shalt.err (!%p180_p1)
}
  0x21   :  { %37 = dma.hbm_to_vmem [thread:$0]  %s267_s1, 256, %s35_s12, [#allocation6]  }
  0x22   :  { %206 = dma.done.wait [#allocation3], 256  }
  0x23   :  { %207 = vsyncadd [#allocation3], 4294967040 }
  0x24   :  { %208 = dma.done.wait [#allocation6], 256  }
  0x25   :  { %209 = vsyncadd [#allocation6], 4294967040  ;;  %v46_v0 = vld [vmem:[#allocation2] sm:$0xff]  ;;  %v47_v1 = vld [vmem:[#allocation2 + $0x8] sm:$0xff]  ;;  %s214_s1 = smov [#allocation7]  }
  0x26   :  { %v56_v2 = vand.u32 2147483647, %v46_v0  ;;  %v57_v3 = vand.u32 2147483647, %v47_v1  ;;  %v48_v14 = vld [vmem:[#allocation5] sm:$0xff]  ;;  %v49_v15 = vld [vmem:[#allocation5 + $0x8] sm:$0xff] }
  0x27   :  { %v50_v17 = vmax.f32 %v46_v0, 0.0  ;;  %v52_v18 = vmul.f32 %v48_v14, %v46_v0  ;;  %v51_v21 = vmax.f32 %v47_v1, 0.0  ;;  %v53_v22 = vmul.f32 %v49_v15, %v47_v1  ;;  %s114_s4 = sshll.u32 %s214_s1, 4  ;;  %s115_s4 = int_to_ptr.vmem [resolvable:$true] %s114_s4 }
  0x28   :  { %v58_v4 = vsub.f32 0.0, %v56_v2  ;;  %v59_v5 = vsub.f32 0.0, %v57_v3  ;;  %s184_s5 = scalar_lea.vmem %s115_s4, 256  ;;  %p189_p3 = scmp.lt.s32.totalorder %s115_s4, %s115_s4 }
  0x29   :  { %v54_v26 = vsub.f32 %v50_v17, %v52_v18  ;;  %v55_v30 = vsub.f32 %v51_v21, %v53_v22  ;;  %p185_p2 = scmp.ne.s32.totalorder %s115_s4, %s184_s5  ;;  %p190_p4 = scmp.lt.s32.totalorder %s184_s5, %s184_s5 }
  0x2a   :  { %v60_v6 = vmul.f32 1.442695, %v58_v4  ;;  %v62_v7 = vmul.f32 1.442695, %v59_v5 }
  0x2b   :  { %p191_p5 = por %p190_p4, %p189_p3 }
  0x2c   :  { %128 = vpow2.f32 %v60_v6 }
  0x2d   :  { %130 = vpow2.f32 %v62_v7  ;;  %p192_p6 = pnand %p191_p5, %p185_p2 }
  0x36   :  { %v129_v8 = vpop.eup %128 }
  0x37   :  { %v131_v9 = vpop.eup %130  ;;  %v64_v10 = vadd.f32 1.0, %v129_v8  ;;  %v67_v12 = vmul.f32 -0.5, %v129_v8  ;;  %v70_v19 = vand.u32 2147483647, %v129_v8 }
  0x38   :  { %v73_v11 = vadd.f32 1.0, %v131_v9  ;;  %v76_v13 = vmul.f32 -0.5, %v131_v9  ;;  %v79_v23 = vand.u32 2147483647, %v131_v9 }
  0x39   :  { %132 = vlog2.f32 %v64_v10  ;;  %v68_v16 = vadd.f32 1.0, %v67_v12  ;;  %vm71_vm0 = vcmp.lt.f32.partialorder %v70_v19, 0.0004427343 }
  0x3a   :  { %134 = vlog2.f32 %v73_v11  ;;  %v77_v20 = vadd.f32 1.0, %v76_v13  ;;  %vm80_vm1 = vcmp.lt.f32.partialorder %v79_v23, 0.0004427343 }
  0x3b   :  { %v69_v24 = vmul.f32 %v129_v8, %v68_v16 }
  0x3c   :  { %v78_v27 = vmul.f32 %v131_v9, %v77_v20 }
  0x43   :  { %v133_v25 = vpop.eup %132 }
  0x44   :  { %v135_v28 = vpop.eup %134  ;;  %v66_v29 = vmul.f32 0.6931472, %v133_v25 }
  0x45   :  { %v75_v31 = vmul.f32 0.6931472, %v135_v28 }
  0x46   :  { %v72_v32 = vsel %vm71_vm0, %v69_v24, %v66_v29 }
  0x47   :  { %v82_v33 = vadd.f32 %v72_v32, %v54_v26  ;;  %v81_v34 = vsel %vm80_vm1, %v78_v27, %v75_v31 }
  0x48   :  { %v83_v35 = vadd.f32 %v81_v34, %v55_v30 }
  0x49   :  { %v84_v36 = vsub.f32 0.0, %v82_v33 }
  0x4a   :  { %v85_v37 = vsub.f32 0.0, %v83_v35 }
  0x4b   :  { %v86_v38 = vmul.f32 1.442695, %v84_v36 }
  0x4c   :  { %v88_v39 = vmul.f32 1.442695, %v85_v37 }
  0x4d   :  { %136 = vpow2.f32 %v86_v38 }
  0x4e   :  { %138 = vpow2.f32 %v88_v39 }
  0x57   :  { %v137_v40 = vpop.eup %136 }
  0x58   :  { %v139_v41 = vpop.eup %138  ;;  %v90_v42 = vsub.f32 1.0, %v137_v40 }
  0x59   :  { %v91_v43 = vsub.f32 1.0, %v139_v41 }
  0x5a   :  { %v92_v44 = vmul.f32 %v90_v42, %v90_v42 }
  0x5b   :  { %v93_v45 = vmul.f32 %v91_v43, %v91_v43 }
  0x5c   :  { %v94_v46 = vmul.f32 %v92_v44, %v82_v33 }
  0x5d   :  { %v95_v47 = vmul.f32 %v93_v45, %v83_v35 }
  0x5e   :  { %106 = vst [vmem:[#allocation7] sm:$0xff] %v94_v46 }
  0x5f   :  { %107 = vst [vmem:[#allocation7 + $0x8] sm:$0xff] %v95_v47 }
  0x60   :  { %195 = shalt.err (!%p192_p6)
}
  0x61   :  { %s196_s8 = scalar_lea.hbm %s268_s2, 256 }
  0x62   :  { %p197_p7 = scmp.ne.s32.totalorder %s268_s2, %s196_s8  ;;  %p200_p8 = scmp.lt.u32.totalorder %s196_s8, %s268_s2 }
  0x64   :  { %p202_p9 = pnand %p200_p8, %p197_p7 }
  0x66   :  { %205 = shalt.err (!%p202_p9)
}
  0x67   :  { %117 = dma.vmem_to_hbm [thread:$0]  %s115_s4, 256, %s268_s2, [#allocation4]  }
  0x68   :  { %210 = dma.done.wait [#allocation4], 256  }
  0x69   :  { %211 = vsyncadd [#allocation4], 4294967040 }
  0x6a   :  { %121 = vsyncpa [#allocation3], 1 }
  0x6b   :  { %122 = vsyncpa [#allocation6], 1 }
  0x6c   :  { %123 = vsyncpa [#allocation4], 1 }

</bundles_post_ra>
